<compile_context>
chip_gen: v5e
topology: v5e:2x2
jax: 0.10.0
libtpu: 0.0.40
codegen_flags: <defaults>
</compile_context>

<pallas_src>
import functools

import jax
import jax.numpy as jnp
from jax import lax
from jax.experimental import pallas as pl
from jax.experimental.pallas import tpu as pltpu

_EPS = 1e-12  # matches torch.nn.functional.normalize default eps


def _round_up(x, m):
    return (x + m - 1) // m * m


@functools.lru_cache(maxsize=None)
def _vmem_limit_bytes():
    # Generation-aware VMEM limit with headroom: ~48 MiB on v7x (64 MiB
    # physical per TC), ~96 MiB on v5e/v6e (128 MiB physical).  Conservative
    # 48 MiB fallback if the query is unavailable.
    cap = 64 * 1024 * 1024
    try:
        cap = int(pltpu.get_tpu_info().vmem_capacity_bytes)
    except Exception:
        pass
    return int(min(cap * 3 // 4, 112 * 1024 * 1024))


def _proxynca_kernel(xn_ref, pnt_ref, y_ref, loss_ref,
                     s_ref, rsum_ref, dlab_ref,
                     *, nb_classes, tile_c, smoothing, pad_cols):
    """One (batch tile, class tile) grid step.

    xn_ref : (tile_n, e_pad) bf16  -- 3*normalize(X) batch tile (pre-normalized)
    pnt_ref: (e_pad, tile_c) bf16  -- 3*normalize(P)^T class tile
    y_ref  : (tile_n, 1) int32     -- integer labels
    loss   : (tile_n, 1) f32       -- per-row loss (written on last class tile)
    scratch: running sum(exp(D-36)), running rowsum(D), D[i, y_i]
    """
    k = pl.program_id(1)
    nk = pl.num_programs(1)

    @pl.when(k == 0)
    def _():
        s_ref[...] = jnp.zeros_like(s_ref)
        rsum_ref[...] = jnp.zeros_like(rsum_ref)
        dlab_ref[...] = jnp.zeros_like(dlab_ref)

    # Squared pairwise distances: ||xn||^2 = ||pn||^2 = 9  =>  D = 18 - 2<xn,pn>.
    xp = jnp.dot(xn_ref[...], pnt_ref[...],
                 preferred_element_type=jnp.float32)            # (tile_n, tile_c)
    d = jnp.maximum(18.0 - 2.0 * xp, 0.0)                       # torch.clamp(min=0)

    # D[i, y_i]: real labels are < nb_classes, so padded columns never match.
    col = k * tile_c + lax.broadcasted_iota(jnp.int32, d.shape, 1)
    lab = y_ref[...]                                            # (tile_n, 1)
    dlab_ref[...] += jnp.sum(jnp.where(col == lab, d, 0.0), axis=-1, keepdims=True)

    # D in [0, 36] -> fixed-shift sum-exp; no online-max bookkeeping needed.
    def accumulate(mask_pad_cols):
        if mask_pad_cols:
            valid = col < nb_classes
            dm = jnp.where(valid, d, 0.0)
            em = jnp.where(valid, jnp.exp(d - 36.0), 0.0)
        else:
            dm = d
            em = jnp.exp(d - 36.0)
        rsum_ref[...] += jnp.sum(dm, axis=-1, keepdims=True)
        s_ref[...] += jnp.sum(em, axis=-1, keepdims=True)

    if pad_cols == 0:
        accumulate(False)
    else:
        # Only the last class tile contains padded columns; mask only there.
        pl.when(k < nk - 1)(lambda: accumulate(False))
        pl.when(k == nk - 1)(lambda: accumulate(True))

    # Finalize per-row loss on the last class tile.
    @pl.when(k == nk - 1)
    def _():
        lse = 36.0 + jnp.log(s_ref[...])
        w_lab = jnp.float32(1.0 - smoothing)
        w_oth = jnp.float32(smoothing / max(nb_classes - 1, 1))
        td = w_lab * dlab_ref[...] + w_oth * (rsum_ref[...] - dlab_ref[...])
        loss_ref[...] = lse - td        # sum_j T_ij == 1


@functools.partial(jax.jit, static_argnames=("smoothing_const",))
def proxynca_loss(X, proxies, labels, *, smoothing_const=0.0):
    N, E = X.shape
    C, E2 = proxies.shape
    assert E == E2

    # Tile sizes: lane axis multiples of 128 (256 for the MXU-facing class
    # axis), sublane multiples of 16 (bf16 packing).  tile_n up to 512 for
    # proxy-stream reuse; tile_c large enough that per-step MXU work dwarfs
    # the ~0.35us pipeline overhead, but capped at 1024 when tile_n=512 to
    # keep intermediates comfortably inside v7x's 64 MiB VMEM.
    tile_n = min(512, _round_up(N, 16))
    tile_c = min(2048 if tile_n <= 256 else 1024, _round_up(C, 256))
    n_pad = _round_up(N, tile_n)
    c_pad = _round_up(C, tile_c)
    e_pad = _round_up(E, 128)

    # Normalize both operands in the wrapper (XLA fuses with the padded
    # copies) and feed bf16 straight to the MXU: halves X HBM traffic and
    # removes per-batch-tile normalization work from the kernel.
    x = X.astype(jnp.float32)
    x_inv = lax.rsqrt(jnp.maximum(jnp.sum(x * x, axis=-1, keepdims=True), _EPS * _EPS))
    xn = (3.0 * x * x_inv).astype(jnp.bfloat16)
    xn_p = jnp.zeros((n_pad, e_pad), jnp.bfloat16).at[:N, :E].set(xn)

    p = proxies.astype(jnp.float32)
    p_inv = lax.rsqrt(jnp.maximum(jnp.sum(p * p, axis=-1, keepdims=True), _EPS * _EPS))
    pn_t = (3.0 * p * p_inv).T.astype(jnp.bfloat16)              # (E, C)
    pn_t = jnp.zeros((e_pad, c_pad), jnp.bfloat16).at[:E, :C].set(pn_t)

    y_p = jnp.zeros((n_pad, 1), jnp.int32).at[:N, 0].set(labels.astype(jnp.int32))

    kernel = functools.partial(_proxynca_kernel, nb_classes=C, tile_c=tile_c,
                               smoothing=float(smoothing_const),
                               pad_cols=c_pad - C)

    per_row = pl.pallas_call(
        kernel,
        out_shape=jax.ShapeDtypeStruct((n_pad, 1), jnp.float32),
        grid_spec=pltpu.PrefetchScalarGridSpec(
            num_scalar_prefetch=0,
            grid=(n_pad // tile_n, c_pad // tile_c),
            in_specs=[
                pl.BlockSpec((tile_n, e_pad), lambda i, k: (i, 0)),   # xn batch tile
                pl.BlockSpec((e_pad, tile_c), lambda i, k: (0, k)),   # proxies^T class tile
                pl.BlockSpec((tile_n, 1), lambda i, k: (i, 0)),       # int labels
            ],
            out_specs=pl.BlockSpec((tile_n, 1), lambda i, k: (i, 0)), # per-row loss
            scratch_shapes=[
                pltpu.VMEM((tile_n, 1), jnp.float32),   # running sum(exp(D - 36))
                pltpu.VMEM((tile_n, 1), jnp.float32),   # running rowsum(D)
                pltpu.VMEM((tile_n, 1), jnp.float32),   # D[i, y_i]
            ],
        ),
        compiler_params=pltpu.CompilerParams(
            dimension_semantics=("parallel", "arbitrary"),
            vmem_limit_bytes=_vmem_limit_bytes(),
        ),
    )(xn_p, pn_t, y_p)

    # Mean over the real batch rows (padding rows sliced off) in JAX, keeping
    # the batch grid axis "parallel" (2-TC megacore friendly on v7x).
    return jnp.sum(per_row[:N, 0]) / jnp.float32(N)


def binarize_and_smooth_labels(T, nb_classes, smoothing_const=0.1):
    # JAX equivalent of the sklearn label_binarize + smoothing path (reference only).
    # TODO(synk): sklearn's nb_classes==2 single-column special case is not replicated.
    onehot = jax.nn.one_hot(T, nb_classes, dtype=jnp.float32)
    return onehot * (1.0 - smoothing_const) + (1.0 - onehot) * (
        smoothing_const / max(nb_classes - 1, 1)
    )


class ProxyNCA:
    def __init__(self, nb_classes, sz_embed, smoothing_const=0.0, key=None):
        if key is None:
            key = jax.random.PRNGKey(0)
        # torch.randn(nb_classes, sz_embed) / 8
        self.proxies = jax.random.normal(key, (nb_classes, sz_embed), jnp.float32) / 8.0
        self.smoothing_const = float(smoothing_const)
        self.nb_classes = nb_classes

    def __call__(self, X, T):
        return proxynca_loss(X, self.proxies, T.astype(jnp.int32),
                             smoothing_const=self.smoothing_const)


def _reference(X, P, T_int, nb_classes, smoothing_const):
    # Pure-JAX f32 transliteration of the PyTorch forward (spec) for validation.
    eps = 1e-12
    xn = 3.0 * X / jnp.maximum(jnp.linalg.norm(X, axis=-1, keepdims=True), eps)
    pn = 3.0 * P / jnp.maximum(jnp.linalg.norm(P, axis=-1, keepdims=True), eps)
    D = (jnp.sum(xn * xn, -1, keepdims=True)
         + jnp.sum(pn * pn, -1)[None, :]
         - 2.0 * xn @ pn.T)
    D = jnp.maximum(D, 0.0)
    T_s = binarize_and_smooth_labels(T_int, nb_classes, smoothing_const)
    log_sm = jax.nn.log_softmax(D, axis=-1)
    return jnp.mean(jnp.sum(-T_s * log_sm, axis=-1))


if __name__ == "__main__":
    nb_classes, sz_embed, batch = 8, 32, 8

    key = jax.random.PRNGKey(0)
    k_proxy, k_x, k_t = jax.random.split(key, 3)

    model = ProxyNCA(nb_classes, sz_embed, smoothing_const=0.1, key=k_proxy)

    X = jax.random.normal(k_x, (batch, sz_embed), jnp.float32)
    T = jax.random.randint(k_t, (batch,), 0, nb_classes, jnp.int32)

    loss = jax.block_until_ready(model(X, T))

    ref = _reference(X, model.proxies, T, nb_classes, model.smoothing_const)
    # bf16 MXU operands inside the kernel vs. f32 reference -> modest tolerance.
    assert jnp.allclose(loss, ref, rtol=5e-2, atol=5e-2), (loss, ref)
    assert jnp.isfinite(loss)

    print("KERNEL_OK")
</pallas_src>

<mosaic_0001>
module attributes {stable_mosaic.version = 11 : i64} {
  func.func @_proxynca_kernel(%arg0: i32, %arg1: i32, %arg2: memref<16x128xbf16, #tpu.memory_space<vmem>>, %arg3: memref<128x256xbf16, #tpu.memory_space<vmem>>, %arg4: memref<16x1xi32, #tpu.memory_space<vmem>>, %arg5: memref<16x1xf32, #tpu.memory_space<vmem>>, %arg6: memref<16x1xf32, #tpu.memory_space<vmem>>, %arg7: memref<16x1xf32, #tpu.memory_space<vmem>>, %arg8: memref<16x1xf32, #tpu.memory_space<vmem>>) attributes {dimension_semantics = [#tpu.dimension_semantics<parallel>, #tpu.dimension_semantics<arbitrary>], iteration_bounds = array<i64: 1, 1>, scalar_prefetch = 0 : i64, scratch_operands = 3 : i64, tpu.core_type = #tpu.core_type<tc>, window_params = [{transform_indices = @transform_0, window_bounds = array<i64: 16, 128>}, {transform_indices = @transform_1, window_bounds = array<i64: 128, 256>}, {transform_indices = @transform_2, window_bounds = array<i64: 16, 1>}, {transform_indices = @transform_3, window_bounds = array<i64: 16, 1>}]} {
    %c0_i32 = arith.constant 0 : i32
    %0 = arith.cmpi eq, %arg1, %c0_i32 : i32
    %1 = arith.extui %0 : i1 to i32
    %c0_i32_0 = arith.constant 0 : i32
    %2 = arith.cmpi ne, %1, %c0_i32_0 : i32
    scf.if %2 {
      %cst_21 = arith.constant 0.000000e+00 : f32
      %35 = vector.broadcast %cst_21 : f32 to vector<16x1xf32>
      %c0_22 = arith.constant 0 : index
      %c0_23 = arith.constant 0 : index
      %36 = vector.load %arg6[%c0_22, %c0_23] : memref<16x1xf32, #tpu.memory_space<vmem>>, vector<16x1xf32>
      tpu.vector_store %arg6[%c0_22, %c0_23], %35 {strides = array<i32>} : memref<16x1xf32, #tpu.memory_space<vmem>>, vector<16x1xf32>,
      %cst_24 = arith.constant 0.000000e+00 : f32
      %37 = vector.broadcast %cst_24 : f32 to vector<16x1xf32>
      %c0_25 = arith.constant 0 : index
      %c0_26 = arith.constant 0 : index
      %38 = vector.load %arg7[%c0_25, %c0_26] : memref<16x1xf32, #tpu.memory_space<vmem>>, vector<16x1xf32>
      tpu.vector_store %arg7[%c0_25, %c0_26], %37 {strides = array<i32>} : memref<16x1xf32, #tpu.memory_space<vmem>>, vector<16x1xf32>,
      %cst_27 = arith.constant 0.000000e+00 : f32
      %39 = vector.broadcast %cst_27 : f32 to vector<16x1xf32>
      %c0_28 = arith.constant 0 : index
      %c0_29 = arith.constant 0 : index
      %40 = vector.load %arg8[%c0_28, %c0_29] : memref<16x1xf32, #tpu.memory_space<vmem>>, vector<16x1xf32>
      tpu.vector_store %arg8[%c0_28, %c0_29], %39 {strides = array<i32>} : memref<16x1xf32, #tpu.memory_space<vmem>>, vector<16x1xf32>,
    } else {
    }
    %c0 = arith.constant 0 : index
    %c0_1 = arith.constant 0 : index
    %3 = vector.load %arg2[%c0, %c0_1] : memref<16x128xbf16, #tpu.memory_space<vmem>>, vector<16x128xbf16>
    %c0_2 = arith.constant 0 : index
    %c0_3 = arith.constant 0 : index
    %4 = vector.load %arg3[%c0_2, %c0_3] : memref<128x256xbf16, #tpu.memory_space<vmem>>, vector<128x256xbf16>
    %cst = arith.constant dense<0.000000e+00> : vector<16x256xf32>
    %5 = tpu.matmul %3, %4, %cst {dimension_numbers = #tpu.dot_dimension_numbers<[1], [0], [0], [1], [0, 0, 1, 1], [], []>} : vector<16x128xbf16>, vector<128x256xbf16>, vector<16x256xf32> -> vector<16x256xf32>
    %cst_4 = arith.constant 2.000000e+00 : f32
    %6 = vector.broadcast %cst_4 : f32 to vector<16x256xf32>
    %7 = arith.mulf %6, %5 : vector<16x256xf32>
    %cst_5 = arith.constant 1.800000e+01 : f32
    %8 = vector.broadcast %cst_5 : f32 to vector<16x256xf32>
    %9 = arith.subf %8, %7 : vector<16x256xf32>
    %cst_6 = arith.constant 0.000000e+00 : f32
    %10 = vector.broadcast %cst_6 : f32 to vector<16x256xf32>
    %11 = arith.maximumf %9, %10 : vector<16x256xf32>
    %c256_i32 = arith.constant 256 : i32
    %12 = arith.muli %arg1, %c256_i32 : i32
    %13 = tpu.iota {dimensions = array<i32: 1>} : vector<16x256xi32>
    %14 = vector.broadcast %12 : i32 to vector<16x256xi32>
    %15 = arith.addi %14, %13 : vector<16x256xi32>
    %c0_7 = arith.constant 0 : index
    %c0_8 = arith.constant 0 : index
    %16 = vector.load %arg4[%c0_7, %c0_8] : memref<16x1xi32, #tpu.memory_space<vmem>>, vector<16x1xi32>
    %c0_9 = arith.constant 0 : index
    %c0_10 = arith.constant 0 : index
    %17 = vector.load %arg8[%c0_9, %c0_10] : memref<16x1xf32, #tpu.memory_space<vmem>>, vector<16x1xf32>
    %18 = vector.broadcast %16 : vector<16x1xi32> to vector<16x256xi32>
    %19 = arith.cmpi eq, %15, %18 : vector<16x256xi32>
    %cst_11 = arith.constant 0.000000e+00 : f32
    %20 = vector.broadcast %cst_11 : f32 to vector<16x256xf32>
    %21 = arith.select %19, %11, %20 : vector<16x256xi1>, vector<16x256xf32>
    %cst_12 = arith.constant dense<0.000000e+00> : vector<16xf32>
    %22 = vector.multi_reduction <add>, %21, %cst_12 [1] : vector<16x256xf32> to vector<16xf32>
    %23 = vector.shape_cast %22 : vector<16xf32> to vector<16x1xf32>
    %24 = arith.addf %17, %23 : vector<16x1xf32>
    %c0_13 = arith.constant 0 : index
    %c0_14 = arith.constant 0 : index
    %25 = vector.load %arg8[%c0_13, %c0_14] : memref<16x1xf32, #tpu.memory_space<vmem>>, vector<16x1xf32>
    tpu.vector_store %arg8[%c0_13, %c0_14], %24 {strides = array<i32>} : memref<16x1xf32, #tpu.memory_space<vmem>>, vector<16x1xf32>,
    %c0_i32_15 = arith.constant 0 : i32
    %26 = arith.cmpi slt, %arg1, %c0_i32_15 : i32
    %27 = arith.extui %26 : i1 to i32
    %c0_i32_16 = arith.constant 0 : i32
    %28 = arith.cmpi ne, %27, %c0_i32_16 : i32
    scf.if %28 {
      %cst_21 = arith.constant 3.600000e+01 : f32
      %35 = vector.broadcast %cst_21 : f32 to vector<16x256xf32>
      %36 = arith.subf %11, %35 : vector<16x256xf32>
      %37 = math.exp %36 : vector<16x256xf32>
      %c0_22 = arith.constant 0 : index
      %c0_23 = arith.constant 0 : index
      %38 = vector.load %arg7[%c0_22, %c0_23] : memref<16x1xf32, #tpu.memory_space<vmem>>, vector<16x1xf32>
      %cst_24 = arith.constant dense<0.000000e+00> : vector<16xf32>
      %39 = vector.multi_reduction <add>, %11, %cst_24 [1] : vector<16x256xf32> to vector<16xf32>
      %40 = vector.shape_cast %39 : vector<16xf32> to vector<16x1xf32>
      %41 = arith.addf %38, %40 : vector<16x1xf32>
      %c0_25 = arith.constant 0 : index
      %c0_26 = arith.constant 0 : index
      %42 = vector.load %arg7[%c0_25, %c0_26] : memref<16x1xf32, #tpu.memory_space<vmem>>, vector<16x1xf32>
      tpu.vector_store %arg7[%c0_25, %c0_26], %41 {strides = array<i32>} : memref<16x1xf32, #tpu.memory_space<vmem>>, vector<16x1xf32>,
      %c0_27 = arith.constant 0 : index
      %c0_28 = arith.constant 0 : index
      %43 = vector.load %arg6[%c0_27, %c0_28] : memref<16x1xf32, #tpu.memory_space<vmem>>, vector<16x1xf32>
      %cst_29 = arith.constant dense<0.000000e+00> : vector<16xf32>
      %44 = vector.multi_reduction <add>, %37, %cst_29 [1] : vector<16x256xf32> to vector<16xf32>
      %45 = vector.shape_cast %44 : vector<16xf32> to vector<16x1xf32>
      %46 = arith.addf %43, %45 : vector<16x1xf32>
      %c0_30 = arith.constant 0 : index
      %c0_31 = arith.constant 0 : index
      %47 = vector.load %arg6[%c0_30, %c0_31] : memref<16x1xf32, #tpu.memory_space<vmem>>, vector<16x1xf32>
      tpu.vector_store %arg6[%c0_30, %c0_31], %46 {strides = array<i32>} : memref<16x1xf32, #tpu.memory_space<vmem>>, vector<16x1xf32>,
    } else {
    }
    %c0_i32_17 = arith.constant 0 : i32
    %29 = arith.cmpi eq, %arg1, %c0_i32_17 : i32
    %30 = arith.extui %29 : i1 to i32
    %c0_i32_18 = arith.constant 0 : i32
    %31 = arith.cmpi ne, %30, %c0_i32_18 : i32
    scf.if %31 {
      %c8_i32 = arith.constant 8 : i32
      %35 = vector.broadcast %c8_i32 : i32 to vector<16x256xi32>
      %36 = arith.cmpi slt, %15, %35 : vector<16x256xi32>
      %cst_21 = arith.constant 0.000000e+00 : f32
      %37 = vector.broadcast %cst_21 : f32 to vector<16x256xf32>
      %38 = arith.select %36, %11, %37 : vector<16x256xi1>, vector<16x256xf32>
      %cst_22 = arith.constant 3.600000e+01 : f32
      %39 = vector.broadcast %cst_22 : f32 to vector<16x256xf32>
      %40 = arith.subf %11, %39 : vector<16x256xf32>
      %41 = math.exp %40 : vector<16x256xf32>
      %cst_23 = arith.constant 0.000000e+00 : f32
      %42 = vector.broadcast %cst_23 : f32 to vector<16x256xf32>
      %43 = arith.select %36, %41, %42 : vector<16x256xi1>, vector<16x256xf32>
      %c0_24 = arith.constant 0 : index
      %c0_25 = arith.constant 0 : index
      %44 = vector.load %arg7[%c0_24, %c0_25] : memref<16x1xf32, #tpu.memory_space<vmem>>, vector<16x1xf32>
      %cst_26 = arith.constant dense<0.000000e+00> : vector<16xf32>
      %45 = vector.multi_reduction <add>, %38, %cst_26 [1] : vector<16x256xf32> to vector<16xf32>
      %46 = vector.shape_cast %45 : vector<16xf32> to vector<16x1xf32>
      %47 = arith.addf %44, %46 : vector<16x1xf32>
      %c0_27 = arith.constant 0 : index
      %c0_28 = arith.constant 0 : index
      %48 = vector.load %arg7[%c0_27, %c0_28] : memref<16x1xf32, #tpu.memory_space<vmem>>, vector<16x1xf32>
      tpu.vector_store %arg7[%c0_27, %c0_28], %47 {strides = array<i32>} : memref<16x1xf32, #tpu.memory_space<vmem>>, vector<16x1xf32>,
      %c0_29 = arith.constant 0 : index
      %c0_30 = arith.constant 0 : index
      %49 = vector.load %arg6[%c0_29, %c0_30] : memref<16x1xf32, #tpu.memory_space<vmem>>, vector<16x1xf32>
      %cst_31 = arith.constant dense<0.000000e+00> : vector<16xf32>
      %50 = vector.multi_reduction <add>, %43, %cst_31 [1] : vector<16x256xf32> to vector<16xf32>
      %51 = vector.shape_cast %50 : vector<16xf32> to vector<16x1xf32>
      %52 = arith.addf %49, %51 : vector<16x1xf32>
      %c0_32 = arith.constant 0 : index
      %c0_33 = arith.constant 0 : index
      %53 = vector.load %arg6[%c0_32, %c0_33] : memref<16x1xf32, #tpu.memory_space<vmem>>, vector<16x1xf32>
      tpu.vector_store %arg6[%c0_32, %c0_33], %52 {strides = array<i32>} : memref<16x1xf32, #tpu.memory_space<vmem>>, vector<16x1xf32>,
    } else {
    }
    %c0_i32_19 = arith.constant 0 : i32
    %32 = arith.cmpi eq, %arg1, %c0_i32_19 : i32
    %33 = arith.extui %32 : i1 to i32
    %c0_i32_20 = arith.constant 0 : i32
    %34 = arith.cmpi ne, %33, %c0_i32_20 : i32
    scf.if %34 {
      %c0_21 = arith.constant 0 : index
      %c0_22 = arith.constant 0 : index
      %35 = vector.load %arg6[%c0_21, %c0_22] : memref<16x1xf32, #tpu.memory_space<vmem>>, vector<16x1xf32>
      %36 = math.log %35 : vector<16x1xf32>
      %cst_23 = arith.constant 3.600000e+01 : f32
      %37 = vector.broadcast %cst_23 : f32 to vector<16x1xf32>
      %38 = arith.addf %37, %36 : vector<16x1xf32>
      %c0_24 = arith.constant 0 : index
      %c0_25 = arith.constant 0 : index
      %39 = vector.load %arg8[%c0_24, %c0_25] : memref<16x1xf32, #tpu.memory_space<vmem>>, vector<16x1xf32>
      %cst_26 = arith.constant 0.899999976 : f32
      %40 = vector.broadcast %cst_26 : f32 to vector<16x1xf32>
      %41 = arith.mulf %40, %39 : vector<16x1xf32>
      %c0_27 = arith.constant 0 : index
      %c0_28 = arith.constant 0 : index
      %42 = vector.load %arg7[%c0_27, %c0_28] : memref<16x1xf32, #tpu.memory_space<vmem>>, vector<16x1xf32>
      %c0_29 = arith.constant 0 : index
      %c0_30 = arith.constant 0 : index
      %43 = vector.load %arg8[%c0_29, %c0_30] : memref<16x1xf32, #tpu.memory_space<vmem>>, vector<16x1xf32>
      %44 = arith.subf %42, %43 : vector<16x1xf32>
      %cst_31 = arith.constant 0.0142857144 : f32
      %45 = vector.broadcast %cst_31 : f32 to vector<16x1xf32>
      %46 = arith.mulf %45, %44 : vector<16x1xf32>
      %47 = arith.addf %41, %46 : vector<16x1xf32>
      %48 = arith.subf %38, %47 : vector<16x1xf32>
      %c0_32 = arith.constant 0 : index
      %c0_33 = arith.constant 0 : index
      %49 = vector.load %arg5[%c0_32, %c0_33] : memref<16x1xf32, #tpu.memory_space<vmem>>, vector<16x1xf32>
      tpu.vector_store %arg5[%c0_32, %c0_33], %48 {strides = array<i32>} : memref<16x1xf32, #tpu.memory_space<vmem>>, vector<16x1xf32>,
    } else {
    }
    return
  }
  func.func @transform_0(%arg0: i32, %arg1: i32) -> (i32, i32) {
    %c0_i32 = arith.constant 0 : i32
    %c0_i32_0 = arith.constant 0 : i32
    return %arg0, %c0_i32 : i32, i32
  }
  func.func @transform_1(%arg0: i32, %arg1: i32) -> (i32, i32) {
    %c0_i32 = arith.constant 0 : i32
    %c0_i32_0 = arith.constant 0 : i32
    return %c0_i32, %arg1 : i32, i32
  }
  func.func @transform_2(%arg0: i32, %arg1: i32) -> (i32, i32) {
    %c0_i32 = arith.constant 0 : i32
    %c0_i32_0 = arith.constant 0 : i32
    return %arg0, %c0_i32 : i32, i32
  }
  func.func @transform_3(%arg0: i32, %arg1: i32) -> (i32, i32) {
    %c0_i32 = arith.constant 0 : i32
    %c0_i32_0 = arith.constant 0 : i32
    return %arg0, %c0_i32 : i32, i32
  }
}

</mosaic_0001>

<bundles_post_ra>
// kernel: proxynca_loss.1
= control target key start
LH: loop header
LB: loop body
LE: loop exit
PB: predicated region body
PF: predicated region fallthrough
CT: control target
= control target key end

     0   :  { %v426_v23 = vmov 0   ;;  %v170_v52 = vlaneseq  ;;  %vm18_vm0 = vcmask 7168   ;;  %v427_v62 = vmov 0.0   ;;  %s577_s1 = inlined_call_operand.vmem [shape: bf16[128,256], index: 1, kind: input, shape index: {}]   ;;  %s578_s2 = inlined_call_operand.vmem [shape: s32[16,1], index: 2, kind: input, shape index: {}]   ;;  %s579_s0 = inlined_call_operand.vmem [shape: bf16[16,128], index: 0, kind: input, shape index: {}]   ;;  %s580_s3 = inlined_call_operand.vmem [shape: f32[16,1], index: 3, kind: output, shape index: {}]  }
   0x1   :  { %v384_v0 = vld [vmem:[%s577_s1 + $0x70] sm:$0xf]  ;;  %v414_v1 = vld [vmem:[%s577_s1 + $0x74] sm:$0xf0]  ;;  %v413_v2 = vld [vmem:[%s577_s1 + $0x74] sm:$0xf]  ;;  %417 = vset.pattern.permute.xlu0 %v426_v23 }
   0x2   :  { %v385_v3 = vor.u32 %v414_v1, %v384_v0  ;;  %v386_v4 = vld [vmem:[%s577_s1 + $0x78] sm:$0xf0]  ;;  %v376_v5 = vld [vmem:[%s577_s1 + $0x60] sm:$0xf]  ;;  %v412_v6 = vld [vmem:[%s577_s1 + $0x64] sm:$0xf0] }
   0x3   :  { %v389_v7 = vor.u32 %v413_v2, %v386_v4  ;;  %v411_v8 = vld [vmem:[%s577_s1 + $0x64] sm:$0xf]  ;;  %v378_v9 = vld [vmem:[%s577_s1 + $0x68] sm:$0xf0]  ;;  %v377_v10 = vor.u32 %v412_v6, %v376_v5  ;;  %v368_v12 = vld [vmem:[%s577_s1 + $0x50] sm:$0xf] }
   0x4   :  { %129 = vmatpush.bf16.msra.mxu0 %v385_v3  ;;  %v381_v11 = vor.u32 %v411_v8, %v378_v9  ;;  %v410_v13 = vld [vmem:[%s577_s1 + $0x54] sm:$0xf0]  ;;  %v409_v14 = vld [vmem:[%s577_s1 + $0x54] sm:$0xf]  ;;  %v370_v15 = vld [vmem:[%s577_s1 + $0x58] sm:$0xf0] }
   0x5   :  { %143 = vmatpush.bf16.msra.mxu1 %v389_v7  ;;  %v369_v16 = vor.u32 %v410_v13, %v368_v12  ;;  %v373_v17 = vor.u32 %v409_v14, %v370_v15  ;;  %v360_v18 = vld [vmem:[%s577_s1 + $0x40] sm:$0xf]  ;;  %v408_v19 = vld [vmem:[%s577_s1 + $0x44] sm:$0xf0]  ;;  %v407_v20 = vld [vmem:[%s577_s1 + $0x44] sm:$0xf] }
   0x6   :  { %v362_v21 = vld [vmem:[%s577_s1 + $0x48] sm:$0xf0]  ;;  %v361_v22 = vor.u32 %v408_v19, %v360_v18  ;;  %v176_v24 = vld [vmem:[%s578_s2] sm:$0xff]  ;;  %v352_v26 = vld [vmem:[%s577_s1 + $0x30] sm:$0xf]  ;;  %v171_v53 = vand.u32 127, %v170_v52 }
   0x7   :  { %v365_v25 = vor.u32 %v407_v20, %v362_v21  ;;  %v406_v27 = vld [vmem:[%s577_s1 + $0x34] sm:$0xf0]  ;;  %181 = vperm.xlu0 %417, %v176_v24   ;;  %v405_v28 = vld [vmem:[%s577_s1 + $0x34] sm:$0xf]  ;;  %v354_v29 = vld [vmem:[%s577_s1 + $0x38] sm:$0xf0] }
   0x8   :  { %130 = vmatpush.bf16.msra.mxu0 %v377_v10  ;;  %v353_v30 = vor.u32 %v406_v27, %v352_v26  ;;  %v357_v31 = vor.u32 %v405_v28, %v354_v29  ;;  %v344_v32 = vld [vmem:[%s577_s1 + $0x20] sm:$0xf]  ;;  %v404_v33 = vld [vmem:[%s577_s1 + $0x24] sm:$0xf0]  ;;  %v403_v34 = vld [vmem:[%s577_s1 + $0x24] sm:$0xf] }
   0x9   :  { %144 = vmatpush.bf16.msra.mxu1 %v381_v11  ;;  %v346_v35 = vld [vmem:[%s577_s1 + $0x28] sm:$0xf0]  ;;  %v345_v37 = vor.u32 %v404_v33, %v344_v32  ;;  %v336_v39 = vld [vmem:[%s577_s1 + $0x10] sm:$0xf]  ;;  %v402_v40 = vld [vmem:[%s577_s1 + $0x14] sm:$0xf0] }
   0xa   :  { %v177_v36 = vld [vmem:[%s578_s2 + $0x8] sm:$0xff]  ;;  %v349_v38 = vor.u32 %v403_v34, %v346_v35  ;;  %v401_v41 = vld [vmem:[%s577_s1 + $0x14] sm:$0xf]  ;;  %v338_v42 = vld [vmem:[%s577_s1 + $0x18] sm:$0xf0]  ;;  %v337_v43 = vor.u32 %v402_v40, %v336_v39  ;;  %v172_v58 = vadd.s32 128, %v171_v53 }
   0xb   :  { %v341_v44 = vor.u32 %v401_v41, %v338_v42  ;;  %v328_v45 = vld [vmem:[%s577_s1] sm:$0xf]  ;;  %v400_v46 = vld [vmem:[%s577_s1 + $0x4] sm:$0xf0]  ;;  %v399_v47 = vld [vmem:[%s577_s1 + $0x4] sm:$0xf] }
   0xc   :  { %131 = vmatpush.bf16.msra.mxu0 %v369_v16  ;;  %v330_v48 = vld [vmem:[%s577_s1 + $0x8] sm:$0xf0]  ;;  %v329_v49 = vor.u32 %v400_v46, %v328_v45  ;;  %v398_v51 = vld [vmem:[%s579_s0] sm:$0xff]  ;;  %vm248_vm2 = vcmp.lt.s32.totalorder %v171_v53, 8  ;;  %21 = vst.msk [vmem:[#allocation3] sm:$0xff] %vm18_vm0, %v427_v62 }
   0xd   :  { %145 = vmatpush.bf16.msra.mxu1 %v373_v17  ;;  %v333_v50 = vor.u32 %v399_v47, %v330_v48  ;;  %19 = vst.msk [vmem:[#allocation2] sm:$0xff] %vm18_vm0, %v427_v62 }
   0xe   :  { %20 = vst.msk [vmem:[#allocation2 + $0x8] sm:$0xff] %vm18_vm0, %v427_v62 }
   0xf   :  { %184 = vperm.xlu0 %417, %v177_v36   ;;  %22 = vst.msk [vmem:[#allocation3 + $0x8] sm:$0xff] %vm18_vm0, %v427_v62 }
  0x10   :  { %132 = vmatpush.bf16.msra.mxu0 %v361_v22  ;;  %23 = vst.msk [vmem:[#allocation4] sm:$0xff] %vm18_vm0, %v427_v62 }
  0x11   :  { %146 = vmatpush.bf16.msra.mxu1 %v365_v25  ;;  %24 = vst.msk [vmem:[#allocation4 + $0x8] sm:$0xff] %vm18_vm0, %v427_v62 }
  0x13   :  { %v270_v26 = vld [vmem:[#allocation3] sm:$0xff] }
  0x14   :  { %133 = vmatpush.bf16.msra.mxu0 %v353_v30  ;;  %v282_v33 = vld [vmem:[#allocation2] sm:$0xff] }
  0x15   :  { %147 = vmatpush.bf16.msra.mxu1 %v357_v31 }
  0x16   :  { %v271_v45 = vld [vmem:[#allocation3 + $0x8] sm:$0xff] }
  0x17   :  { %v178_v29 = vld [vmem:[#allocation4] sm:$0xff] }
  0x18   :  { %134 = vmatpush.bf16.msra.mxu0 %v345_v37  ;;  %v179_v32 = vld [vmem:[#allocation4 + $0x8] sm:$0xff] }
  0x19   :  { %148 = vmatpush.bf16.msra.mxu1 %v349_v38  ;;  %v283_v38 = vld [vmem:[#allocation2 + $0x8] sm:$0xff] }
  0x1c   :  { %135 = vmatpush.bf16.msra.mxu0 %v337_v43 }
  0x1d   :  { %149 = vmatpush.bf16.msra.mxu1 %v341_v44 }
  0x20   :  { %136 = vmatpush.bf16.msra.mxu0 %v329_v49 }
  0x21   :  { %150 = vmatpush.bf16.msra.mxu1 %v333_v50 }
  0x23   :  { %137 = vmatmul.bf16.vlgmr.msra.gmra.mxu0 %v398_v51 }
  0x24   :  { %151 = vmatmul.bf16.vlgmr.msra.gmra.mxu1 %v398_v51 }
  0x79   :  { %v182_v54 = vpop.permute.xlu0 %181 }
  0x7a   :  { %vm186_vm1 = vcmp.eq.s32.totalorder %v171_v53, %v182_v54  ;;  %vm187_vm3 = vcmp.eq.s32.totalorder %v172_v58, %v182_v54 }
  0x81   :  { %v185_v10 = vpop.permute.xlu0 %184 }
  0x82   :  { %vm188_vm4 = vcmp.eq.s32.totalorder %v171_v53, %v185_v10  ;;  %vm189_vm5 = vcmp.eq.s32.totalorder %v172_v58, %v185_v10 }
  0xa0   :  { %v138_v55 = vpop.f32.mrf.mxu0 }
  0xa1   :  { %v157_v56 = vmul.f32 2.0, %v138_v55  ;;  %v152_v57 = vpop.f32.mrf.mxu1 }
  0xa2   :  { %v158_v59 = vmul.f32 2.0, %v152_v57 }
  0xa3   :  { %v161_v60 = vsub.f32 18.0, %v157_v56 }
  0xa4   :  { %v162_v61 = vsub.f32 18.0, %v158_v59 }
  0xa5   :  { %v165_v63 = vmax.f32 %v161_v60, 0.0 }
  0xa6   :  { %v166_v0 = vmax.f32 %v162_v61, 0.0 }
  0xa7   :  { %v394_v1 = vadd.f32 -36.0, %v165_v63  ;;  %v250_v2 = vsel %vm248_vm2, %v165_v63, 0.0  ;;  %v190_v3 = vsel %vm186_vm1, %v165_v63, 0.0 }
  0xa8   :  { %273 = vadd.xlane.f32.xlu0 %v250_v2  ;;  %v140_v4 = vpop.f32.mrf.mxu0  ;;  %v191_v5 = vsel %vm187_vm3, %v166_v0, 0.0 }
  0xa9   :  { %v258_v6 = vmul.f32 1.442695, %v394_v1  ;;  %v154_v7 = vpop.f32.mrf.mxu1  ;;  %v159_v8 = vmul.f32 2.0, %v140_v4  ;;  %v194_v9 = vadd.f32 %v191_v5, %v190_v3 }
  0xaa   :  { %v160_v11 = vmul.f32 2.0, %v154_v7 }
  0xab   :  { %v163_v12 = vsub.f32 18.0, %v159_v8  ;;  %195 = vadd.xlane.f32.xlu2 %v194_v9  ;;  %418 = vpow2.f32 %v258_v6 }
  0xac   :  { %v164_v13 = vsub.f32 18.0, %v160_v11 }
  0xad   :  { %v167_v14 = vmax.f32 %v163_v12, 0.0 }
  0xae   :  { %v168_v15 = vmax.f32 %v164_v13, 0.0 }
  0xaf   :  { %v396_v16 = vadd.f32 -36.0, %v167_v14  ;;  %v192_v17 = vsel %vm188_vm4, %v167_v14, 0.0  ;;  %v252_v25 = vsel %vm248_vm2, %v167_v14, 0.0 }
  0xb0   :  { %v193_v18 = vsel %vm189_vm5, %v168_v15, 0.0 }
  0xb1   :  { %v419_v19 = vpop.eup %418  ;;  %v262_v20 = vmul.f32 1.442695, %v396_v16  ;;  %v197_v21 = vadd.f32 %v193_v18, %v192_v17 }
  0xb2   :  { %v266_v22 = vsel %vm248_vm2, %v419_v19, 0.0 }
  0xb3   :  { %420 = vpow2.f32 %v262_v20  ;;  %198 = vadd.xlane.f32.xlu2 %v197_v21  ;;  %285 = vadd.xlane.f32.xlu1 %v266_v22 }
  0xb9   :  { %v421_v23 = vpop.eup %420 }
  0xba   :  { %v268_v24 = vsel %vm248_vm2, %v421_v23, 0.0 }
  0xbb   :  { %288 = vadd.xlane.f32.xlu1 %v268_v24 }
  0xc3   :  { %276 = vadd.xlane.f32.xlu1 %v252_v25 }
 0x11b   :  { %v274_v27 = vpop.xlane.xlu0 %273 }
 0x11c   :  { %v278_v28 = vadd.f32 %v274_v27, %v270_v26 }
 0x11e   :  { %280 = vst.msk [vmem:[#allocation3] sm:$0xff] %vm18_vm0, %v278_v28  ;;  %v196_v30 = vpop.xlane.xlu2 %195 }
 0x11f   :  { %v200_v31 = vadd.f32 %v196_v30, %v178_v29 }
 0x121   :  { %203 = vst.msk [vmem:[#allocation4] sm:$0xff] %vm18_vm0, %v200_v31 }
 0x125   :  { %v306_v43 = vld [vmem:[#allocation3] sm:$0xff] }
 0x126   :  { %v199_v34 = vpop.xlane.xlu2 %198  ;;  %v286_v35 = vpop.xlane.xlu1 %285 }
 0x127   :  { %v201_v36 = vadd.f32 %v199_v34, %v179_v32  ;;  %v290_v37 = vadd.f32 %v286_v35, %v282_v33 }
 0x128   :  { %v302_v41 = vld [vmem:[#allocation4] sm:$0xff] }
 0x129   :  { %204 = vst.msk [vmem:[#allocation4 + $0x8] sm:$0xff] %vm18_vm0, %v201_v36  ;;  %v308_v44 = vsub.f32 %v306_v43, %v302_v41  ;;  %v304_v51 = vmul.f32 0.9, %v302_v41 }
 0x12a   :  { %292 = vst.msk [vmem:[#allocation2] sm:$0xff] %vm18_vm0, %v290_v37 }
 0x12b   :  { %v310_v47 = vmul.f32 0.014285714, %v308_v44 }
 0x12d   :  { %v312_v53 = vadd.f32 %v310_v47, %v304_v51 }
 0x12e   :  { %v289_v39 = vpop.xlane.xlu1 %288 }
 0x12f   :  { %v291_v40 = vadd.f32 %v289_v39, %v283_v38 }
 0x130   :  { %v303_v57 = vld [vmem:[#allocation4 + $0x8] sm:$0xff] }
 0x131   :  { %v294_v42 = vld [vmem:[#allocation2] sm:$0xff]  ;;  %293 = vst.msk [vmem:[#allocation2 + $0x8] sm:$0xff] %vm18_vm0, %v291_v40  ;;  %v305_v61 = vmul.f32 0.9, %v303_v57 }
 0x132   :  { %422 = vlog2.f32 %v294_v42 }
 0x136   :  { %v277_v46 = vpop.xlane.xlu1 %276 }
 0x137   :  { %v279_v48 = vadd.f32 %v277_v46, %v271_v45 }
 0x138   :  { %v423_v49 = vpop.eup %422  ;;  %v295_v50 = vld [vmem:[#allocation2 + $0x8] sm:$0xff] }
 0x139   :  { %v297_v52 = vmul.f32 0.6931472, %v423_v49  ;;  %424 = vlog2.f32 %v295_v50  ;;  %281 = vst.msk [vmem:[#allocation3 + $0x8] sm:$0xff] %vm18_vm0, %v279_v48 }
 0x13b   :  { %v300_v54 = vadd.f32 36.0, %v297_v52 }
 0x13d   :  { %v314_v55 = vsub.f32 %v300_v54, %v312_v53 }
 0x13f   :  { %v425_v56 = vpop.eup %424  ;;  %316 = vst.msk [vmem:[%s580_s3] sm:$0xff] %vm18_vm0, %v314_v55 }
 0x140   :  { %v307_v58 = vld [vmem:[#allocation3 + $0x8] sm:$0xff]  ;;  %v299_v59 = vmul.f32 0.6931472, %v425_v56 }
 0x141   :  { %v309_v60 = vsub.f32 %v307_v58, %v303_v57 }
 0x142   :  { %v301_v63 = vadd.f32 36.0, %v299_v59 }
 0x143   :  { %v311_v62 = vmul.f32 0.014285714, %v309_v60 }
 0x145   :  { %v313_v0 = vadd.f32 %v311_v62, %v305_v61 }
 0x147   :  { %v315_v1 = vsub.f32 %v301_v63, %v313_v0 }
 0x149   :  { %317 = vst.msk [vmem:[%s580_s3 + $0x8] sm:$0xff] %vm18_vm0, %v315_v1 }

</bundles_post_ra>
